<compile_context>
chip_gen: v7x
topology: tpu7x:2x2x1
jax: 0.10.0
libtpu: 0.0.40
codegen_flags: <defaults>
</compile_context>

<pallas_src>
import math

import jax
import jax.numpy as jnp
from jax.experimental import pallas as pl
from jax.experimental.pallas import tpu as pltpu

D_IN = 256
D_H = 256
D_OUT = 4
D_OUT_PAD = 128  # lane-dense padded width of the final layer


def box_mlp_kernel(x_ref, w1_ref, b1_ref, w2_ref, b2_ref, w3_ref, b3_ref, o_ref):
    # x_ref: (tm, 256) bf16 row tile. Weights bf16, biases f32, accumulate f32.
    x = x_ref[...]
    h = jnp.dot(x, w1_ref[...], preferred_element_type=jnp.float32) + b1_ref[...]
    h = jnp.maximum(h, 0.0)
    h = jnp.dot(h.astype(w2_ref.dtype), w2_ref[...],
                preferred_element_type=jnp.float32) + b2_ref[...]
    h = jnp.maximum(h, 0.0)
    y = jnp.dot(h.astype(w3_ref.dtype), w3_ref[...],
                preferred_element_type=jnp.float32) + b3_ref[...]
    o_ref[...] = y.astype(o_ref.dtype)


def _round_up(a, b):
    return (a + b - 1) // b * b


def prepare_params(params):
    """One-time conversion from PyTorch nn.Linear layout (W:(out,in), b:(out,))
    to kernel layout: transposed bf16 weights, f32 row biases, last layer padded
    from 4 to 128 output columns."""
    w1, b1, w2, b2, w3, b3 = params
    w1t = w1.T.astype(jnp.bfloat16)                       # (256, 256)
    w2t = w2.T.astype(jnp.bfloat16)                       # (256, 256)
    w3t = jnp.zeros((D_H, D_OUT_PAD), jnp.bfloat16).at[:, :D_OUT].set(
        w3.T.astype(jnp.bfloat16))                        # (256, 128)
    b1r = b1.reshape(1, D_H).astype(jnp.float32)
    b2r = b2.reshape(1, D_H).astype(jnp.float32)
    b3r = jnp.zeros((1, D_OUT_PAD), jnp.float32).at[0, :D_OUT].set(
        b3.astype(jnp.float32))
    return (w1t, b1r, w2t, b2r, w3t, b3r)


def box_layer(x, prepared_params, *, max_tm=512):
    """x: (..., 256) float. Returns (..., 4) float32."""
    w1t, b1r, w2t, b2r, w3t, b3r = prepared_params
    lead_shape = x.shape[:-1]
    n = math.prod(lead_shape) if lead_shape else 1
    x2 = x.reshape(n, D_IN).astype(jnp.bfloat16)

    # Row tiling: single grid step when everything fits in one tile, otherwise
    # max_tm rows per step (>= 128/256 MXU rows, ~0.25 MiB of bf16 x per tile).
    n_pad = _round_up(n, 8)
    if n_pad <= max_tm:
        tm = n_pad
    else:
        tm = max_tm
        n_pad = _round_up(n, tm)
    if n_pad != n:
        x2 = jnp.pad(x2, ((0, n_pad - n), (0, 0)))

    grid = (n_pad // tm,)
    semantics = ("parallel",) if grid[0] >= 4 else ("arbitrary",)

    flops = 2 * n_pad * (D_IN * D_H + D_H * D_H + D_H * D_OUT_PAD)
    bytes_accessed = (
        x2.size * 2
        + (w1t.size + w2t.size + w3t.size) * 2
        + (b1r.size + b2r.size + b3r.size) * 4
        + n_pad * D_OUT_PAD * 4
    )

    out = pl.pallas_call(
        box_mlp_kernel,
        out_shape=jax.ShapeDtypeStruct((n_pad, D_OUT_PAD), jnp.float32),
        grid_spec=pl.GridSpec(
            grid=grid,
            in_specs=[
                pl.BlockSpec((tm, D_IN), lambda i: (i, 0)),          # x rows
                pl.BlockSpec((D_IN, D_H), lambda i: (0, 0)),         # W1^T
                pl.BlockSpec((1, D_H), lambda i: (0, 0)),            # b1
                pl.BlockSpec((D_H, D_H), lambda i: (0, 0)),          # W2^T
                pl.BlockSpec((1, D_H), lambda i: (0, 0)),            # b2
                pl.BlockSpec((D_H, D_OUT_PAD), lambda i: (0, 0)),    # W3^T (padded)
                pl.BlockSpec((1, D_OUT_PAD), lambda i: (0, 0)),      # b3 (padded)
            ],
            out_specs=pl.BlockSpec((tm, D_OUT_PAD), lambda i: (i, 0)),
        ),
        compiler_params=pltpu.CompilerParams(dimension_semantics=semantics),
        cost_estimate=pl.CostEstimate(
            flops=flops, transcendentals=0, bytes_accessed=bytes_accessed),
    )(x2, w1t, b1r, w2t, b2r, w3t, b3r)

    # Drop row padding and the padded output lanes.
    return out[:n, :D_OUT].reshape(*lead_shape, D_OUT)


box_layer_jit = jax.jit(box_layer, static_argnames=("max_tm",))


def init_params(key):
    # Deterministic synthetic init matching nn.Linear: W (out, in), b (out,).
    ks = jax.random.split(key, 6)

    def lin(kw, kb, fan_in, fan_out):
        bound = 1.0 / jnp.sqrt(fan_in)
        w = jax.random.uniform(kw, (fan_out, fan_in), jnp.float32, -bound, bound)
        b = jax.random.uniform(kb, (fan_out,), jnp.float32, -bound, bound)
        return w, b

    w1, b1 = lin(ks[0], ks[1], D_IN, D_H)
    w2, b2 = lin(ks[2], ks[3], D_H, D_H)
    w3, b3 = lin(ks[4], ks[5], D_H, D_OUT)
    return (w1, b1, w2, b2, w3, b3)


def reference(x, params):
    w1, b1, w2, b2, w3, b3 = params
    h = jnp.maximum(x @ w1.T + b1, 0.0)
    h = jnp.maximum(h @ w2.T + b2, 0.0)
    return h @ w3.T + b3


if __name__ == "__main__":
    key = jax.random.PRNGKey(0)
    kx, kp = jax.random.split(key)
    batch, seq = 2, 8
    x = jax.random.normal(kx, (batch, seq, D_IN), dtype=jnp.float32)

    params = init_params(kp)
    prepared = prepare_params(params)  # hoisted one-time transpose/pad

    y = box_layer_jit(x, prepared)
    y = jax.block_until_ready(y)

    y_ref = reference(x, params)
    assert y.shape == (batch, seq, D_OUT)
    # bf16 weights/activations (f32 accumulation) -> relaxed tolerance vs f32 ref.
    err = float(jnp.max(jnp.abs(y - y_ref)))
    scale = float(jnp.max(jnp.abs(y_ref))) + 1e-6
    assert err <= 5e-2 + 5e-2 * scale, f"max abs err {err} (scale {scale})"
    print("KERNEL_OK")
</pallas_src>

<mosaic_0001>
module attributes {stable_mosaic.version = 11 : i64} {
  func.func @box_mlp_kernel(%arg0: i32, %arg1: memref<16x256xbf16, #tpu.memory_space<vmem>>, %arg2: memref<256x256xbf16, #tpu.memory_space<vmem>>, %arg3: memref<1x256xf32, #tpu.memory_space<vmem>>, %arg4: memref<256x256xbf16, #tpu.memory_space<vmem>>, %arg5: memref<1x256xf32, #tpu.memory_space<vmem>>, %arg6: memref<256x128xbf16, #tpu.memory_space<vmem>>, %arg7: memref<1x128xf32, #tpu.memory_space<vmem>>, %arg8: memref<16x128xf32, #tpu.memory_space<vmem>>) attributes {dimension_semantics = [#tpu.dimension_semantics<arbitrary>], iteration_bounds = array<i64: 1>, scalar_prefetch = 0 : i64, scratch_operands = 0 : i64, tpu.core_type = #tpu.core_type<tc>, window_params = [{transform_indices = @transform_0, window_bounds = array<i64: 16, 256>}, {pipeline_mode = #tpu.pipeline_mode<synchronous>, transform_indices = @transform_1, window_bounds = array<i64: 256, 256>}, {pipeline_mode = #tpu.pipeline_mode<synchronous>, transform_indices = @transform_2, window_bounds = array<i64: 1, 256>}, {pipeline_mode = #tpu.pipeline_mode<synchronous>, transform_indices = @transform_3, window_bounds = array<i64: 256, 256>}, {pipeline_mode = #tpu.pipeline_mode<synchronous>, transform_indices = @transform_4, window_bounds = array<i64: 1, 256>}, {pipeline_mode = #tpu.pipeline_mode<synchronous>, transform_indices = @transform_5, window_bounds = array<i64: 256, 128>}, {pipeline_mode = #tpu.pipeline_mode<synchronous>, transform_indices = @transform_6, window_bounds = array<i64: 1, 128>}, {transform_indices = @transform_7, window_bounds = array<i64: 16, 128>}]} {
    %c0 = arith.constant 0 : index
    %c0_0 = arith.constant 0 : index
    %0 = vector.load %arg1[%c0, %c0_0] : memref<16x256xbf16, #tpu.memory_space<vmem>>, vector<16x256xbf16>
    %c0_1 = arith.constant 0 : index
    %c0_2 = arith.constant 0 : index
    %1 = vector.load %arg2[%c0_1, %c0_2] : memref<256x256xbf16, #tpu.memory_space<vmem>>, vector<256x256xbf16>
    %cst = arith.constant dense<0.000000e+00> : vector<16x256xf32>
    %2 = tpu.matmul %0, %1, %cst {dimension_numbers = #tpu.dot_dimension_numbers<[1], [0], [0], [1], [0, 0, 1, 1], [], []>} : vector<16x256xbf16>, vector<256x256xbf16>, vector<16x256xf32> -> vector<16x256xf32>
    %c0_3 = arith.constant 0 : index
    %c0_4 = arith.constant 0 : index
    %3 = vector.load %arg3[%c0_3, %c0_4] : memref<1x256xf32, #tpu.memory_space<vmem>>, vector<1x256xf32>
    %4 = vector.broadcast %3 : vector<1x256xf32> to vector<16x256xf32>
    %5 = arith.addf %2, %4 : vector<16x256xf32>
    %cst_5 = arith.constant 0.000000e+00 : f32
    %6 = vector.broadcast %cst_5 : f32 to vector<16x256xf32>
    %7 = arith.maximumf %5, %6 : vector<16x256xf32>
    %8 = arith.truncf %7 : vector<16x256xf32> to vector<16x256xbf16>
    %c0_6 = arith.constant 0 : index
    %c0_7 = arith.constant 0 : index
    %9 = vector.load %arg4[%c0_6, %c0_7] : memref<256x256xbf16, #tpu.memory_space<vmem>>, vector<256x256xbf16>
    %cst_8 = arith.constant dense<0.000000e+00> : vector<16x256xf32>
    %10 = tpu.matmul %8, %9, %cst_8 {dimension_numbers = #tpu.dot_dimension_numbers<[1], [0], [0], [1], [0, 0, 1, 1], [], []>} : vector<16x256xbf16>, vector<256x256xbf16>, vector<16x256xf32> -> vector<16x256xf32>
    %c0_9 = arith.constant 0 : index
    %c0_10 = arith.constant 0 : index
    %11 = vector.load %arg5[%c0_9, %c0_10] : memref<1x256xf32, #tpu.memory_space<vmem>>, vector<1x256xf32>
    %12 = vector.broadcast %11 : vector<1x256xf32> to vector<16x256xf32>
    %13 = arith.addf %10, %12 : vector<16x256xf32>
    %cst_11 = arith.constant 0.000000e+00 : f32
    %14 = vector.broadcast %cst_11 : f32 to vector<16x256xf32>
    %15 = arith.maximumf %13, %14 : vector<16x256xf32>
    %16 = arith.truncf %15 : vector<16x256xf32> to vector<16x256xbf16>
    %c0_12 = arith.constant 0 : index
    %c0_13 = arith.constant 0 : index
    %17 = vector.load %arg6[%c0_12, %c0_13] : memref<256x128xbf16, #tpu.memory_space<vmem>>, vector<256x128xbf16>
    %cst_14 = arith.constant dense<0.000000e+00> : vector<16x128xf32>
    %18 = tpu.matmul %16, %17, %cst_14 {dimension_numbers = #tpu.dot_dimension_numbers<[1], [0], [0], [1], [0, 0, 1, 1], [], []>} : vector<16x256xbf16>, vector<256x128xbf16>, vector<16x128xf32> -> vector<16x128xf32>
    %c0_15 = arith.constant 0 : index
    %c0_16 = arith.constant 0 : index
    %19 = vector.load %arg7[%c0_15, %c0_16] : memref<1x128xf32, #tpu.memory_space<vmem>>, vector<1x128xf32>
    %20 = vector.broadcast %19 : vector<1x128xf32> to vector<16x128xf32>
    %21 = arith.addf %18, %20 : vector<16x128xf32>
    %c0_17 = arith.constant 0 : index
    %c0_18 = arith.constant 0 : index
    %22 = vector.load %arg8[%c0_17, %c0_18] : memref<16x128xf32, #tpu.memory_space<vmem>>, vector<16x128xf32>
    tpu.vector_store %arg8[%c0_17, %c0_18], %21 {strides = array<i32>} : memref<16x128xf32, #tpu.memory_space<vmem>>, vector<16x128xf32>,
    return
  }
  func.func @transform_0(%arg0: i32) -> (i32, i32) {
    %c0_i32 = arith.constant 0 : i32
    %c0_i32_0 = arith.constant 0 : i32
    return %arg0, %c0_i32 : i32, i32
  }
  func.func @transform_1(%arg0: i32) -> (i32, i32) {
    %c0_i32 = arith.constant 0 : i32
    %c0_i32_0 = arith.constant 0 : i32
    %c0_i32_1 = arith.constant 0 : i32
    return %c0_i32, %c0_i32_0 : i32, i32
  }
  func.func @transform_2(%arg0: i32) -> (i32, i32) {
    %c0_i32 = arith.constant 0 : i32
    %c0_i32_0 = arith.constant 0 : i32
    %c0_i32_1 = arith.constant 0 : i32
    return %c0_i32, %c0_i32_0 : i32, i32
  }
  func.func @transform_3(%arg0: i32) -> (i32, i32) {
    %c0_i32 = arith.constant 0 : i32
    %c0_i32_0 = arith.constant 0 : i32
    %c0_i32_1 = arith.constant 0 : i32
    return %c0_i32, %c0_i32_0 : i32, i32
  }
  func.func @transform_4(%arg0: i32) -> (i32, i32) {
    %c0_i32 = arith.constant 0 : i32
    %c0_i32_0 = arith.constant 0 : i32
    %c0_i32_1 = arith.constant 0 : i32
    return %c0_i32, %c0_i32_0 : i32, i32
  }
  func.func @transform_5(%arg0: i32) -> (i32, i32) {
    %c0_i32 = arith.constant 0 : i32
    %c0_i32_0 = arith.constant 0 : i32
    %c0_i32_1 = arith.constant 0 : i32
    return %c0_i32, %c0_i32_0 : i32, i32
  }
  func.func @transform_6(%arg0: i32) -> (i32, i32) {
    %c0_i32 = arith.constant 0 : i32
    %c0_i32_0 = arith.constant 0 : i32
    %c0_i32_1 = arith.constant 0 : i32
    return %c0_i32, %c0_i32_0 : i32, i32
  }
  func.func @transform_7(%arg0: i32) -> (i32, i32) {
    %c0_i32 = arith.constant 0 : i32
    %c0_i32_0 = arith.constant 0 : i32
    return %arg0, %c0_i32 : i32, i32
  }
}

</mosaic_0001>

<bundles_post_ra>
// kernel: box_layer.1
= control target key start
LH: loop header
LB: loop body
LE: loop exit
PB: predicated region body
PF: predicated region fallthrough
CT: control target
= control target key end

     0   :  { %12 = vsyncpa [#allocation3], 0  ;;  %s1178_s0 = inlined_call_operand.vmem [shape: bf16[16,256], index: 0, kind: input, shape index: {}]   ;;  %s1179_s1 = inlined_call_operand.hbm [shape: bf16[256,256], index: 1, kind: input, shape index: {}]   ;;  %s1180_s2 = inlined_call_operand.vmem [shape: f32[1,256], index: 2, kind: input, shape index: {}]   ;;  %s1181_s3 = inlined_call_operand.hbm [shape: bf16[256,256], index: 3, kind: input, shape index: {}]   ;;  %s1182_s4 = inlined_call_operand.vmem [shape: f32[1,256], index: 4, kind: input, shape index: {}]   ;;  %s1183_s5 = inlined_call_operand.hbm [shape: bf16[256,128], index: 5, kind: input, shape index: {}]   ;;  %s1184_s6 = inlined_call_operand.vmem [shape: f32[1,128], index: 6, kind: input, shape index: {}]   ;;  %s1185_s7 = inlined_call_operand.vmem [shape: f32[16,128], index: 7, kind: output, shape index: {}]  }
   0x1   :  { %13 = vsyncpa [#allocation5], 0  ;;  %s1067_s24 = smov [#allocation4]   ;;  %s1068_s26 = smov [#allocation2]  }
   0x2   :  { %s35_s25 = sshll.u32 %s1067_s24, 4  ;;  %s21_s27 = sshll.u32 %s1068_s26, 4  ;;  %s36_s25 = int_to_ptr.vmem [resolvable:$true] %s35_s25  ;;  %s1114_s27 = int_to_ptr.vmem [resolvable:$true] %s21_s27 }
   0x3   :  { %s997_s30 = scalar_lea.hbm %s1181_s3, 4096 }
   0x4   :  { %p998_p0 = scmp.ne.s32.totalorder %s1181_s3, %s997_s30  ;;  %p1001_p1 = scmp.lt.u32.totalorder %s997_s30, %s1181_s3 }
   0x6   :  { %p1003_p2 = pnand %p1001_p1, %p998_p0 }
   0x8   :  { %1006 = shalt.err (!%p1003_p2)
}
   0x9   :  { %s1007_s12 = scalar_lea.vmem %s36_s25, 4096  ;;  %p1012_p4 = scmp.lt.s32.totalorder %s36_s25, %s36_s25 }
   0xa   :  { %p1008_p3 = scmp.ne.s32.totalorder %s36_s25, %s1007_s12  ;;  %p1013_p5 = scmp.lt.s32.totalorder %s1007_s12, %s1007_s12 }
   0xc   :  { %p1014_p6 = por %p1013_p5, %p1012_p4 }
   0xe   :  { %p1015_p7 = pnand %p1014_p6, %p1008_p3 }
  0x10   :  { %1018 = shalt.err (!%p1015_p7)
}
  0x11   :  { %s1069_s13 = smov 128   ;;  %s1070_s14 = smov 8  }
  0x12   :  { %41 = dma.hbm_to_vmem [thread:$0]  %s1181_s3, 4096, %s36_s25, [#allocation5], %s1069_s13, %s1069_s13, %s1070_s14  }
  0x13   :  { %s1019_s19 = scalar_lea.hbm %s1179_s1, 4096 }
  0x14   :  { %p1020_p8 = scmp.ne.s32.totalorder %s1179_s1, %s1019_s19  ;;  %p1023_p9 = scmp.lt.u32.totalorder %s1019_s19, %s1179_s1 }
  0x16   :  { %p1025_p10 = pnand %p1023_p9, %p1020_p8 }
  0x18   :  { %1028 = shalt.err (!%p1025_p10)
}
  0x19   :  { %s1029_s24 = scalar_lea.vmem %s1114_s27, 4096  ;;  %p1034_p12 = scmp.lt.s32.totalorder %s1114_s27, %s1114_s27 }
  0x1a   :  { %p1030_p11 = scmp.ne.s32.totalorder %s1114_s27, %s1029_s24  ;;  %p1035_p13 = scmp.lt.s32.totalorder %s1029_s24, %s1029_s24 }
  0x1c   :  { %p1036_p0 = por %p1035_p13, %p1034_p12 }
  0x1e   :  { %p1037_p1 = pnand %p1036_p0, %p1030_p11 }
  0x20   :  { %1040 = shalt.err (!%p1037_p1)
}
  0x21   :  { %27 = dma.hbm_to_vmem [thread:$0]  %s1179_s1, 4096, %s1114_s27, [#allocation3], %s1069_s13, %s1069_s13, %s1070_s14  }
  0x22   :  { %s1071_s26 = smov [#allocation6]   ;;  %s1041_s8 = scalar_lea.hbm %s1183_s5, 2048 }
  0x23   :  { %s49_s28 = sshll.u32 %s1071_s26, 4  ;;  %p1042_p2 = scmp.ne.s32.totalorder %s1183_s5, %s1041_s8  ;;  %s50_s28 = int_to_ptr.vmem [resolvable:$true] %s49_s28 }
  0x24   :  { %p1045_p3 = scmp.lt.u32.totalorder %s1041_s8, %s1183_s5 }
  0x26   :  { %p1047_p4 = pnand %p1045_p3, %p1042_p2 }
  0x28   :  { %1050 = shalt.err (!%p1047_p4)
}
  0x29   :  { %s1051_s15 = scalar_lea.vmem %s50_s28, 2048  ;;  %p1056_p6 = scmp.lt.s32.totalorder %s50_s28, %s50_s28 }
  0x2a   :  { %p1052_p5 = scmp.ne.s32.totalorder %s50_s28, %s1051_s15  ;;  %p1057_p7 = scmp.lt.s32.totalorder %s1051_s15, %s1051_s15 }
  0x2c   :  { %p1058_p8 = por %p1057_p7, %p1056_p6 }
  0x2e   :  { %p1059_p9 = pnand %p1058_p8, %p1052_p5 }
  0x30   :  { %1062 = shalt.err (!%p1059_p9)
}
  0x31   :  { %s1072_s1 = smov 64   ;;  %s1073_s27 = smov 4  }
  0x32   :  { %55 = dma.hbm_to_vmem [thread:$0]  %s1183_s5, 2048, %s50_s28, [#allocation5], %s1072_s1, %s1072_s1, %s1073_s27  }
  0x33   :  { %1063 = dma.done.wait [#allocation3], 4096  }
  0x34   :  { %1064 = vsyncadd [#allocation3], 4294963200 }
  0x35   :  { %1065 = dma.done.wait [#allocation5], 6144  }
  0x36   :  { %1066 = vsyncadd [#allocation5], 4294961152  ;;  %v882_v0 = vld [vmem:[#allocation2 + $0x4] ss:$8 sps:$4 sm:$0xff]   ;;  %v884_v1 = vld [vmem:[#allocation2] ss:$8 sps:$4 sm:$0xff]  }
  0x37   :  { %284 = vmatprep.subr.bf16.mxu0 %v882_v0  ;;  %v885_v2 = vld [vmem:[#allocation2 + $0x14] ss:$8 sps:$4 sm:$0xff]   ;;  %v887_v3 = vld [vmem:[#allocation2 + $0x10] ss:$8 sps:$4 sm:$0xff]   ;;  %v888_v4 = vld [vmem:[#allocation2 + $0x24] ss:$8 sps:$4 sm:$0xff]  }
  0x38   :  { %285 = vmatpush1.bf16.msra.mxu0 %v884_v1  ;;  %v890_v5 = vld [vmem:[#allocation2 + $0x20] ss:$8 sps:$4 sm:$0xff]   ;;  %v891_v6 = vld [vmem:[#allocation2 + $0x34] ss:$8 sps:$4 sm:$0xff]   ;;  %v893_v7 = vld [vmem:[#allocation2 + $0x30] ss:$8 sps:$4 sm:$0xff]  }
  0x39   :  { %286 = vmatprep.subr.bf16.mxu0 %v885_v2  ;;  %v894_v8 = vld [vmem:[#allocation2 + $0x44] ss:$8 sps:$4 sm:$0xff]   ;;  %v896_v9 = vld [vmem:[#allocation2 + $0x40] ss:$8 sps:$4 sm:$0xff]   ;;  %v897_v10 = vld [vmem:[#allocation2 + $0x54] ss:$8 sps:$4 sm:$0xff]  }
  0x3a   :  { %v899_v11 = vld [vmem:[#allocation2 + $0x50] ss:$8 sps:$4 sm:$0xff]   ;;  %v900_v12 = vld [vmem:[#allocation2 + $0x64] ss:$8 sps:$4 sm:$0xff]   ;;  %v902_v13 = vld [vmem:[#allocation2 + $0x60] ss:$8 sps:$4 sm:$0xff]  }
  0x3b   :  { %v903_v14 = vld [vmem:[#allocation2 + $0x74] ss:$8 sps:$4 sm:$0xff]   ;;  %v932_v15 = vld [vmem:[%s1178_s0 + $0x4] ss:$8 sps:$4 sm:$0xff]   ;;  %v935_v17 = vld [vmem:[#allocation4] ss:$8 sps:$4 sm:$0xff]  }
  0x3c   :  { %287 = vmatpush1.bf16.msra.mxu0 %v887_v3  ;;  %v933_v16 = vld [vmem:[#allocation4 + $0x4] ss:$8 sps:$4 sm:$0xff]   ;;  %316 = vmatprep.mubr.bf16.mxu0 %v932_v15  ;;  %v936_v18 = vld [vmem:[#allocation4 + $0x14] ss:$8 sps:$4 sm:$0xff]   ;;  %v938_v19 = vld [vmem:[#allocation4 + $0x10] ss:$8 sps:$4 sm:$0xff]  }
  0x3d   :  { %288 = vmatprep.subr.bf16.mxu0 %v888_v4  ;;  %537 = vmatprep.subr.bf16.mxu1 %v933_v16  ;;  %v905_v20 = vld [vmem:[#allocation2 + $0x70] ss:$8 sps:$4 sm:$0xff]   ;;  %v939_v21 = vld [vmem:[#allocation4 + $0x24] ss:$8 sps:$4 sm:$0xff]   ;;  %v941_v23 = vld [vmem:[#allocation4 + $0x20] ss:$8 sps:$4 sm:$0xff]  }
  0x3e   :  { %538 = vmatpush1.bf16.msra.mxu1 %v935_v17  ;;  %v906_v22 = vld [vmem:[#allocation2 + $0x84] ss:$8 sps:$4 sm:$0xff]   ;;  %v908_v24 = vld [vmem:[#allocation2 + $0x80] ss:$8 sps:$4 sm:$0xff]   ;;  %v942_v25 = vld [vmem:[#allocation4 + $0x34] ss:$8 sps:$4 sm:$0xff]  }
  0x3f   :  { %539 = vmatprep.subr.bf16.mxu1 %v936_v18  ;;  %v909_v26 = vld [vmem:[#allocation2 + $0x94] ss:$8 sps:$4 sm:$0xff]   ;;  %v944_v27 = vld [vmem:[#allocation4 + $0x30] ss:$8 sps:$4 sm:$0xff]   ;;  %v945_v29 = vld [vmem:[#allocation4 + $0x44] ss:$8 sps:$4 sm:$0xff]  }
  0x40   :  { %289 = vmatpush1.bf16.msra.mxu0 %v890_v5  ;;  %v911_v28 = vld [vmem:[#allocation2 + $0x90] ss:$8 sps:$4 sm:$0xff]   ;;  %v912_v30 = vld [vmem:[#allocation2 + $0xa4] ss:$8 sps:$4 sm:$0xff]   ;;  %v914_v31 = vld [vmem:[#allocation2 + $0xa0] ss:$8 sps:$4 sm:$0xff]  }
  0x41   :  { %290 = vmatprep.subr.bf16.mxu0 %v891_v6  ;;  %v947_v32 = vld [vmem:[#allocation4 + $0x40] ss:$8 sps:$4 sm:$0xff]   ;;  %v915_v33 = vld [vmem:[#allocation2 + $0xb4] ss:$8 sps:$4 sm:$0xff]   ;;  %v950_v35 = vld [vmem:[#allocation4 + $0x50] ss:$8 sps:$4 sm:$0xff]  }
  0x42   :  { %540 = vmatpush1.bf16.msra.mxu1 %v938_v19  ;;  %v948_v34 = vld [vmem:[#allocation4 + $0x54] ss:$8 sps:$4 sm:$0xff]   ;;  %v917_v36 = vld [vmem:[#allocation2 + $0xb0] ss:$8 sps:$4 sm:$0xff]   ;;  %v951_v37 = vld [vmem:[#allocation4 + $0x64] ss:$8 sps:$4 sm:$0xff]  }
  0x43   :  { %541 = vmatprep.subr.bf16.mxu1 %v939_v21  ;;  %v918_v38 = vld [vmem:[#allocation2 + $0xc4] ss:$8 sps:$4 sm:$0xff]   ;;  %v953_v39 = vld [vmem:[#allocation4 + $0x60] ss:$8 sps:$4 sm:$0xff]   ;;  %v954_v41 = vld [vmem:[#allocation4 + $0x74] ss:$8 sps:$4 sm:$0xff]  }
  0x44   :  { %291 = vmatpush1.bf16.msra.mxu0 %v893_v7  ;;  %v920_v40 = vld [vmem:[#allocation2 + $0xc0] ss:$8 sps:$4 sm:$0xff]   ;;  %v921_v42 = vld [vmem:[#allocation2 + $0xd4] ss:$8 sps:$4 sm:$0xff]   ;;  %v956_v43 = vld [vmem:[#allocation4 + $0x70] ss:$8 sps:$4 sm:$0xff]  }
  0x45   :  { %292 = vmatprep.subr.bf16.mxu0 %v894_v8  ;;  %v923_v44 = vld [vmem:[#allocation2 + $0xd0] ss:$8 sps:$4 sm:$0xff]   ;;  %v957_v45 = vld [vmem:[#allocation4 + $0x84] ss:$8 sps:$4 sm:$0xff]   ;;  %v959_v47 = vld [vmem:[#allocation4 + $0x80] ss:$8 sps:$4 sm:$0xff]  }
  0x46   :  { %542 = vmatpush1.bf16.msra.mxu1 %v941_v23  ;;  %v924_v46 = vld [vmem:[#allocation2 + $0xe4] ss:$8 sps:$4 sm:$0xff]   ;;  %v926_v48 = vld [vmem:[#allocation2 + $0xe0] ss:$8 sps:$4 sm:$0xff]   ;;  %v960_v49 = vld [vmem:[#allocation4 + $0x94] ss:$8 sps:$4 sm:$0xff]  }
  0x47   :  { %543 = vmatprep.subr.bf16.mxu1 %v942_v25  ;;  %v927_v50 = vld [vmem:[#allocation2 + $0xf4] ss:$8 sps:$4 sm:$0xff]   ;;  %v962_v51 = vld [vmem:[#allocation4 + $0x90] ss:$8 sps:$4 sm:$0xff]   ;;  %v963_v53 = vld [vmem:[#allocation4 + $0xa4] ss:$8 sps:$4 sm:$0xff]  }
  0x48   :  { %293 = vmatpush1.bf16.msra.mxu0 %v896_v9  ;;  %v929_v52 = vld [vmem:[#allocation2 + $0xf0] ss:$8 sps:$4 sm:$0xff]   ;;  %v930_v54 = vld [vmem:[%s1178_s0] ss:$8 sps:$4 sm:$0xff]   ;;  %v966_v56 = vld [vmem:[#allocation4 + $0xb4] ss:$8 sps:$4 sm:$0xff]  }
  0x49   :  { %294 = vmatprep.subr.bf16.mxu0 %v897_v10  ;;  %v965_v55 = vld [vmem:[#allocation4 + $0xa0] ss:$8 sps:$4 sm:$0xff]   ;;  %v968_v57 = vld [vmem:[#allocation4 + $0xb0] ss:$8 sps:$4 sm:$0xff]   ;;  %v969_v58 = vld [vmem:[#allocation4 + $0xc4] ss:$8 sps:$4 sm:$0xff]  }
  0x4a   :  { %544 = vmatpush1.bf16.msra.mxu1 %v944_v27  ;;  %v971_v59 = vld [vmem:[#allocation4 + $0xc0] ss:$8 sps:$4 sm:$0xff]   ;;  %v972_v60 = vld [vmem:[#allocation4 + $0xd4] ss:$8 sps:$4 sm:$0xff]   ;;  %v974_v61 = vld [vmem:[#allocation4 + $0xd0] ss:$8 sps:$4 sm:$0xff]  }
  0x4b   :  { %545 = vmatprep.subr.bf16.mxu1 %v945_v29  ;;  %v975_v62 = vld [vmem:[#allocation4 + $0xe4] ss:$8 sps:$4 sm:$0xff]   ;;  %v977_v63 = vld [vmem:[#allocation4 + $0xe0] ss:$8 sps:$4 sm:$0xff]   ;;  %v978_v0 = vld [vmem:[#allocation4 + $0xf4] ss:$8 sps:$4 sm:$0xff]  }
  0x4c   :  { %295 = vmatpush1.bf16.msra.mxu0 %v899_v11  ;;  %v980_v1 = vld [vmem:[#allocation4 + $0xf0] ss:$8 sps:$4 sm:$0xff]   ;;  %v981_v2 = vld [vmem:[#allocation6 + $0x40] sm:$0xff]   ;;  %v983_v4 = vld [vmem:[#allocation6 + $0x48] sm:$0xff]  }
  0x4d   :  { %296 = vmatprep.subr.bf16.mxu0 %v900_v12  ;;  %v982_v3 = vld [vmem:[#allocation6] sm:$0xff]   ;;  %v984_v5 = vld [vmem:[#allocation6 + $0x8] sm:$0xff]   ;;  %v985_v6 = vld [vmem:[#allocation6 + $0x50] sm:$0xff]  }
  0x4e   :  { %546 = vmatpush1.bf16.msra.mxu1 %v947_v32  ;;  %v986_v7 = vld [vmem:[#allocation6 + $0x10] sm:$0xff]   ;;  %v987_v8 = vld [vmem:[#allocation6 + $0x58] sm:$0xff]   ;;  %v989_v10 = vld [vmem:[#allocation6 + $0x60] sm:$0xff]  }
  0x4f   :  { %547 = vmatprep.subr.bf16.mxu1 %v948_v34  ;;  %v988_v9 = vld [vmem:[#allocation6 + $0x18] sm:$0xff]   ;;  %v990_v11 = vld [vmem:[#allocation6 + $0x20] sm:$0xff]   ;;  %v991_v12 = vld [vmem:[#allocation6 + $0x68] sm:$0xff]  }
  0x50   :  { %297 = vmatpush1.bf16.msra.mxu0 %v902_v13  ;;  %v104_v13 = vlaneseq  ;;  %v102_v16 = vld [vmem:[%s1180_s2] sm:$0x3]  ;;  %v992_v34 = vld [vmem:[#allocation6 + $0x28] sm:$0xff]  }
  0x51   :  { %298 = vmatprep.subr.bf16.mxu0 %v903_v14 }
  0x52   :  { %548 = vmatpush1.bf16.msra.mxu1 %v950_v35  ;;  %v105_v14 = vshrl.u32 %v104_v13, 7  ;;  %v993_v35 = vld [vmem:[#allocation6 + $0x70] sm:$0xff]  }
  0x53   :  { %549 = vmatprep.subr.bf16.mxu1 %v951_v37  ;;  %v995_v37 = vld [vmem:[#allocation6 + $0x78] sm:$0xff]  }
  0x54   :  { %299 = vmatpush1.bf16.msra.mxu0 %v905_v20  ;;  %v106_v15 = vsub.s32 0, %v105_v14  ;;  %v110_v17 = vsub.s32 1, %v105_v14 }
  0x55   :  { %300 = vmatprep.subr.bf16.mxu0 %v906_v22 }
  0x56   :  { %550 = vmatpush1.bf16.msra.mxu1 %v953_v39  ;;  %v107_v18 = vrot.slane %v102_v16, %v106_v15  ;;  %v111_v19 = vrot.slane %v102_v16, %v110_v17  ;;  %v365_v39 = vld [vmem:[%s1182_s4] sm:$0x3] }
  0x57   :  { %551 = vmatprep.subr.bf16.mxu1 %v954_v41  ;;  %v374_v41 = vrot.slane %v365_v39, %v110_v17 }
  0x58   :  { %301 = vmatpush1.bf16.msra.mxu0 %v908_v24 }
  0x59   :  { %302 = vmatprep.subr.bf16.mxu0 %v909_v26 }
  0x5a   :  { %552 = vmatpush1.bf16.msra.mxu1 %v956_v43 }
  0x5b   :  { %553 = vmatprep.subr.bf16.mxu1 %v957_v45 }
  0x5c   :  { %303 = vmatpush1.bf16.msra.mxu0 %v911_v28 }
  0x5d   :  { %304 = vmatprep.subr.bf16.mxu0 %v912_v30 }
  0x5e   :  { %554 = vmatpush1.bf16.msra.mxu1 %v959_v47 }
  0x5f   :  { %555 = vmatprep.subr.bf16.mxu1 %v960_v49 }
  0x60   :  { %305 = vmatpush1.bf16.msra.mxu0 %v914_v31 }
  0x61   :  { %306 = vmatprep.subr.bf16.mxu0 %v915_v33 }
  0x62   :  { %556 = vmatpush1.bf16.msra.mxu1 %v962_v51 }
  0x63   :  { %557 = vmatprep.subr.bf16.mxu1 %v963_v53 }
  0x64   :  { %307 = vmatpush1.bf16.msra.mxu0 %v917_v36  ;;  %v994_v36 = vld [vmem:[#allocation6 + $0x30] sm:$0xff]  }
  0x65   :  { %308 = vmatprep.subr.bf16.mxu0 %v918_v38  ;;  %v996_v38 = vld [vmem:[#allocation6 + $0x38] sm:$0xff]  }
  0x66   :  { %558 = vmatpush1.bf16.msra.mxu1 %v965_v55 }
  0x67   :  { %559 = vmatprep.subr.bf16.mxu1 %v966_v56 }
  0x68   :  { %309 = vmatpush1.bf16.msra.mxu0 %v920_v40  ;;  %v370_v40 = vrot.slane %v365_v39, %v106_v15 }
  0x69   :  { %310 = vmatprep.subr.bf16.mxu0 %v921_v42 }
  0x6a   :  { %560 = vmatpush1.bf16.msra.mxu1 %v968_v57  ;;  %v836_v57 = vld [vmem:[%s1184_s6] ss:$0 sm:$0xff] }
  0x6b   :  { %561 = vmatprep.subr.bf16.mxu1 %v969_v58 }
  0x6c   :  { %311 = vmatpush1.bf16.msra.mxu0 %v923_v44 }
  0x6d   :  { %312 = vmatprep.subr.bf16.mxu0 %v924_v46 }
  0x6e   :  { %562 = vmatpush1.bf16.msra.mxu1 %v971_v59 }
  0x6f   :  { %563 = vmatprep.subr.bf16.mxu1 %v972_v60 }
  0x70   :  { %313 = vmatpush1.bf16.msra.mxu0 %v926_v48 }
  0x71   :  { %314 = vmatprep.subr.bf16.mxu0 %v927_v50 }
  0x72   :  { %564 = vmatpush1.bf16.msra.mxu1 %v974_v61 }
  0x73   :  { %565 = vmatprep.subr.bf16.mxu1 %v975_v62 }
  0x74   :  { %315 = vmatpush1.bf16.msra.mxu0 %v929_v52 }
  0x75   :  { %853 = vmatprep.subr.bf16.mxu0 %v981_v2 }
  0x76   :  { %566 = vmatpush1.bf16.msra.mxu1 %v977_v63 }
  0x77   :  { %317 = vmatmul.mubr.bf16.vlgmr.msra.gmra.mrb[0].mxu0 %v930_v54  ;;  %567 = vmatprep.subr.bf16.mxu1 %v978_v0 }
  0x78   :  { %854 = vmatpush3.bf16.msra.mxu0 %v982_v3 }
  0x79   :  { %855 = vmatprep.subr.bf16.mxu0 %v983_v4 }
  0x7a   :  { %568 = vmatpush1.bf16.msra.mxu1 %v980_v1 }
  0x7c   :  { %856 = vmatpush3.bf16.msra.mxu0 %v984_v5 }
  0x7d   :  { %857 = vmatprep.subr.bf16.mxu0 %v985_v6 }
  0x80   :  { %858 = vmatpush3.bf16.msra.mxu0 %v986_v7 }
  0x81   :  { %859 = vmatprep.subr.bf16.mxu0 %v987_v8 }
  0x84   :  { %860 = vmatpush3.bf16.msra.mxu0 %v988_v9 }
  0x85   :  { %861 = vmatprep.subr.bf16.mxu0 %v989_v10 }
  0x88   :  { %862 = vmatpush3.bf16.msra.mxu0 %v990_v11 }
  0x89   :  { %863 = vmatprep.subr.bf16.mxu0 %v991_v12 }
  0x8c   :  { %864 = vmatpush3.bf16.msra.mxu0 %v992_v34 }
  0x8d   :  { %865 = vmatprep.subr.bf16.mxu0 %v993_v35 }
  0x90   :  { %866 = vmatpush3.bf16.msra.mxu0 %v994_v36 }
  0x91   :  { %867 = vmatprep.subr.bf16.mxu0 %v995_v37 }
  0x94   :  { %868 = vmatpush3.bf16.msra.mxu0 %v996_v38 }
 0x14a   :  { %v318_v20 = vpop.f32.mrb[0].mxu0 }
 0x14b   :  { %v319_v21 = vadd.f32 %v318_v20, %v107_v18  ;;  %v320_v22 = vpop.f32.mrb[1].mxu0 }
 0x14c   :  { %v321_v23 = vadd.f32 %v320_v22, %v111_v19  ;;  %v322_v24 = vpop.f32.mrb[2].mxu0 }
 0x14d   :  { %v323_v25 = vadd.f32 %v322_v24, %v107_v18  ;;  %v324_v26 = vpop.f32.mrb[3].mxu0  ;;  %v327_v28 = vmax.f32 %v319_v21, 0.0 }
 0x14e   :  { %v325_v27 = vadd.f32 %v324_v26, %v111_v19  ;;  %v328_v30 = vmax.f32 %v321_v23, 0.0 }
 0x14f   :  { %v329_v29 = vmax.f32 %v323_v25, 0.0 }
 0x150   :  { %v330_v31 = vmax.f32 %v325_v27, 0.0 }
 0x151   :  { %v331_v32 = vpack.c.bf16 %v329_v29, %v327_v28 }
 0x152   :  { %v332_v33 = vpack.c.bf16 %v330_v31, %v328_v30 }
 0x154   :  { %569 = vmatprep.mubr.bf16.mxu1 %v332_v33 }
 0x155   :  { %570 = vmatmul.mubr.bf16.vlgmr.msra.gmra.mrb[0].mxu1 %v331_v32 }
 0x228   :  { %v571_v42 = vpop.f32.mrb[0].mxu1 }
 0x229   :  { %v572_v43 = vadd.f32 %v571_v42, %v370_v40  ;;  %v573_v44 = vpop.f32.mrb[1].mxu1 }
 0x22a   :  { %v574_v45 = vadd.f32 %v573_v44, %v374_v41  ;;  %v575_v46 = vpop.f32.mrb[2].mxu1 }
 0x22b   :  { %v576_v47 = vadd.f32 %v575_v46, %v370_v40  ;;  %v577_v48 = vpop.f32.mrb[3].mxu1  ;;  %v580_v50 = vmax.f32 %v572_v43, 0.0 }
 0x22c   :  { %v578_v49 = vadd.f32 %v577_v48, %v374_v41  ;;  %v581_v52 = vmax.f32 %v574_v45, 0.0 }
 0x22d   :  { %v582_v51 = vmax.f32 %v576_v47, 0.0 }
 0x22e   :  { %v583_v53 = vmax.f32 %v578_v49, 0.0 }
 0x22f   :  { %v584_v54 = vpack.c.bf16 %v582_v51, %v580_v50 }
 0x230   :  { %v585_v55 = vpack.c.bf16 %v583_v53, %v581_v52 }
 0x232   :  { %753 = vmatprep.mubr.bf16.mxu0 %v585_v55 }
 0x233   :  { %754 = vmatmul.mubr.bf16.vlgmr.msra.gmra.mrb[4].mxu0 %v584_v54 }
 0x306   :  { %v869_v56 = vpop.f32.mrb[4].mxu0 }
 0x307   :  { %v870_v58 = vpop.f32.mrb[5].mxu0 }
 0x308   :  { %v871_v59 = vadd.f32 %v870_v58, %v869_v56  ;;  %v872_v60 = vpop.f32.mrb[6].mxu0 }
 0x309   :  { %v873_v61 = vpop.f32.mrb[7].mxu0 }
 0x30a   :  { %v756_v62 = vadd.f32 %v871_v59, %v836_v57  ;;  %v874_v63 = vadd.f32 %v873_v61, %v872_v60 }
 0x30c   :  { %762 = vst [vmem:[%s1185_s7] sm:$0xff] %v756_v62  ;;  %v759_v0 = vadd.f32 %v874_v63, %v836_v57 }
 0x30e   :  { %763 = vst [vmem:[%s1185_s7 + $0x8] sm:$0xff] %v759_v0 }
 0x30f   :  { %768 = vsyncpa [#allocation3], 1 }
 0x310   :  { %769 = vsyncpa [#allocation5], 1 }

</bundles_post_ra>
